<compile_context>
chip_gen: v5e
topology: v5e:2x2
jax: 0.10.0
libtpu: 0.0.40
codegen_flags: <defaults>
</compile_context>

<pallas_src>
import jax
import jax.numpy as jnp
from jax.experimental import pallas as pl
from jax.experimental.pallas import tpu as pltpu


# ----------------------------- encode kernel -------------------------------
# grid = (M//tm, S//tn, A); A (innermost) is the reduction over autoencoders.
def _encode_kernel(x_ref, we_ref, bsum_ref, out_ref, acc_ref):
    a = pl.program_id(2)

    @pl.when(a == 0)
    def _():
        acc_ref[...] = jnp.zeros_like(acc_ref)

    # (tm, D) @ (D, tn) -> accumulate in f32
    acc_ref[...] += jnp.dot(x_ref[0], we_ref[0], preferred_element_type=jnp.float32)

    @pl.when(a == pl.num_programs(2) - 1)
    def _():
        # Bias (pre-summed over A) added once; vanilla SAE activation == ReLU.
        out_ref[...] = jnp.maximum(
            acc_ref[...] + bsum_ref[...].astype(jnp.float32), 0.0
        ).astype(out_ref.dtype)


# ----------------------------- decode kernel -------------------------------
# grid = (A, M//tm, S//tk); the S axis (innermost) is the K-reduction.
def _decode_kernel(e_ref, wd_ref, bd_ref, out_ref, acc_ref):
    k = pl.program_id(2)

    @pl.when(k == 0)
    def _():
        acc_ref[...] = jnp.zeros_like(acc_ref)

    # (tm, tk) @ (tk, D) -> accumulate in f32
    acc_ref[...] += jnp.dot(e_ref[...], wd_ref[0], preferred_element_type=jnp.float32)

    @pl.when(k == pl.num_programs(2) - 1)
    def _():
        out_ref[0] = (acc_ref[...] + bd_ref[0].astype(jnp.float32)).astype(out_ref.dtype)


def _pick_tile(total, target, align, want_multi=False):
    """Largest tile <= target that is a multiple of `align` and divides `total`.
    Falls back to the full extent if `total` is not aligned."""
    if total % align != 0:
        return total
    cap = min(target, total)
    if want_multi and total >= 2 * align:
        cap = min(cap, total // 2)  # keep >= 2 grid steps on the parallel M axis
    t = max(align, cap - cap % align)
    while total % t != 0:
        t -= align
    return t


def crosscoder_forward(x_stack, w_enc, b_enc_sum, w_dec, b_dec, *,
                       out_dtype=None, tm=None, tn=None, tk=None,
                       vmem_limit_bytes=64 * 1024 * 1024):
    """
    x_stack   : (A, M, D)  stacked, token-flattened inputs (compute dtype, e.g. bf16)
    w_enc     : (A, D, S)  encoder weights, pre-transposed
    b_enc_sum : (1, S)     sum_a b_enc_a (f32)
    w_dec     : (A, S, D)  decoder weights, pre-transposed
    b_dec     : (A, 1, D)  (f32)
    returns (encoded (M, S) in x_stack.dtype, decoded (A, M, D) in out_dtype)
    """
    A, M, D = x_stack.shape
    S = w_enc.shape[-1]
    out_dtype = x_stack.dtype if out_dtype is None else out_dtype

    sublane = 16 if x_stack.dtype == jnp.bfloat16 else 8
    if tm is None:
        tm = _pick_tile(M, 512, sublane, want_multi=True)
    if tn is None:
        tn = _pick_tile(S, 512, 128)
    if tk is None:
        tk = _pick_tile(S, 512, 128)
    assert M % tm == 0 and S % tn == 0 and S % tk == 0

    # ---- encode: grid (M//tm, S//tn, A); A reduction innermost ----
    encoded = pl.pallas_call(
        _encode_kernel,
        out_shape=jax.ShapeDtypeStruct((M, S), x_stack.dtype),
        grid_spec=pltpu.PrefetchScalarGridSpec(
            num_scalar_prefetch=0,
            grid=(M // tm, S // tn, A),
            in_specs=[
                pl.BlockSpec((1, tm, D), lambda i, j, a: (a, i, 0)),
                pl.BlockSpec((1, D, tn), lambda i, j, a: (a, 0, j)),
                pl.BlockSpec((1, tn), lambda i, j, a: (0, j)),
            ],
            out_specs=pl.BlockSpec((tm, tn), lambda i, j, a: (i, j)),
            scratch_shapes=[pltpu.VMEM((tm, tn), jnp.float32)],
        ),
        compiler_params=pltpu.CompilerParams(
            dimension_semantics=("parallel", "parallel", "arbitrary"),
            vmem_limit_bytes=vmem_limit_bytes,
        ),
    )(x_stack, w_enc, b_enc_sum)

    # ---- decode: grid (A, M//tm, S//tk); sparse-dim K-reduction innermost ----
    decoded = pl.pallas_call(
        _decode_kernel,
        out_shape=jax.ShapeDtypeStruct((A, M, D), out_dtype),
        grid_spec=pltpu.PrefetchScalarGridSpec(
            num_scalar_prefetch=0,
            grid=(A, M // tm, S // tk),
            in_specs=[
                pl.BlockSpec((tm, tk), lambda a, i, k: (i, k)),
                pl.BlockSpec((1, tk, D), lambda a, i, k: (a, k, 0)),
                pl.BlockSpec((1, 1, D), lambda a, i, k: (a, 0, 0)),
            ],
            out_specs=pl.BlockSpec((1, tm, D), lambda a, i, k: (a, i, 0)),
            scratch_shapes=[pltpu.VMEM((tm, D), jnp.float32)],
        ),
        compiler_params=pltpu.CompilerParams(
            dimension_semantics=("parallel", "parallel", "arbitrary"),
            vmem_limit_bytes=vmem_limit_bytes,
        ),
    )(encoded, w_dec, b_dec)

    return encoded, decoded


def crosscoder_sae(x_list, params, *, compute_dtype=jnp.bfloat16,
                   tm=None, tn=None, tk=None):
    """Wrapper mirroring CrossCoderSAE.forward.

    x_list: list of (b, n, d) arrays, one per autoencoder.
    Returns (encoded (b, n, s) in compute_dtype, [decoded_a (b, n, d) per ae]).
    """
    # TODO(synk): only the 'vanilla' (ReLU) SAE variant is implemented; 'topk'
    # activation would need an extra top-k masking pass on the encoded tile.
    b, n, d = x_list[0].shape
    A = len(x_list)
    out_dtype = x_list[0].dtype

    x_stack = jnp.stack([x.reshape(b * n, d) for x in x_list], axis=0).astype(compute_dtype)
    w_enc = params["w_enc"].astype(compute_dtype)
    w_dec = params["w_dec"].astype(compute_dtype)
    # Mathematically only sum_a b_enc_a is needed; fold it into the finalize step.
    b_enc_sum = jnp.sum(params["b_enc"].astype(jnp.float32), axis=0)  # (1, S)
    b_dec = params["b_dec"].astype(jnp.float32)

    enc_flat, dec_flat = crosscoder_forward(
        x_stack, w_enc, b_enc_sum, w_dec, b_dec,
        out_dtype=out_dtype, tm=tm, tn=tn, tk=tk)

    s = enc_flat.shape[-1]
    encoded = enc_flat.reshape(b, n, s)
    decoded = [dec_flat[a].reshape(b, n, d) for a in range(A)]
    return encoded, decoded


def init_params(key, n_autoencoders, embed_dim, sparse_dim, dtype=jnp.float32):
    # Deterministic synthetic init (≈ nn.Linear uniform(-1/sqrt(fan_in), ..)).
    ks = jax.random.split(key, 4)
    lim_e = 1.0 / jnp.sqrt(embed_dim)
    lim_d = 1.0 / jnp.sqrt(sparse_dim)
    w_enc = jax.random.uniform(
        ks[0], (n_autoencoders, embed_dim, sparse_dim), dtype, -lim_e, lim_e)
    b_enc = jax.random.uniform(
        ks[1], (n_autoencoders, 1, sparse_dim), dtype, -lim_e, lim_e)
    w_dec = jax.random.uniform(
        ks[2], (n_autoencoders, sparse_dim, embed_dim), dtype, -lim_d, lim_d)
    b_dec = jax.random.uniform(
        ks[3], (n_autoencoders, 1, embed_dim), dtype, -lim_d, lim_d)
    return {"w_enc": w_enc, "b_enc": b_enc, "w_dec": w_dec, "b_dec": b_dec}


if __name__ == "__main__":
    n_autoencoders = 2
    batch, seq = 2, 16                 # M = b*n = 32
    embed_dim, sparse_dim = 128, 256   # lane-aligned last dims

    key = jax.random.PRNGKey(0)
    kx, kp = jax.random.split(key)
    x_keys = jax.random.split(kx, n_autoencoders)
    x_list = [
        jax.random.normal(x_keys[a], (batch, seq, embed_dim), jnp.float32)
        for a in range(n_autoencoders)
    ]
    params = init_params(kp, n_autoencoders, embed_dim, sparse_dim)

    # Small explicit tiles so every grid axis (incl. S tiling / K reduction)
    # actually takes >= 2 steps at this toy size.
    encoded, decoded = crosscoder_sae(x_list, params, tm=16, tn=128, tk=128)
    jax.block_until_ready(encoded)
    for d_a in decoded:
        jax.block_until_ready(d_a)

    # Pure-JAX reference with the same bf16-compute / f32-accumulate recipe.
    M = batch * seq
    xc = [x.reshape(M, embed_dim).astype(jnp.bfloat16) for x in x_list]
    we = params["w_enc"].astype(jnp.bfloat16)
    wd = params["w_dec"].astype(jnp.bfloat16)
    b_enc_sum = jnp.sum(params["b_enc"].astype(jnp.float32), axis=0)
    pre = sum(
        jnp.dot(xc[a], we[a], preferred_element_type=jnp.float32)
        for a in range(n_autoencoders)
    ) + b_enc_sum
    enc_ref_flat = jnp.maximum(pre, 0.0).astype(jnp.bfloat16)
    enc_ref = enc_ref_flat.reshape(batch, seq, sparse_dim)
    assert jnp.allclose(encoded.astype(jnp.float32), enc_ref.astype(jnp.float32),
                        atol=2e-2, rtol=2e-2), "encode mismatch"
    for a in range(n_autoencoders):
        dec_ref = (
            jnp.dot(enc_ref_flat, wd[a], preferred_element_type=jnp.float32)
            + params["b_dec"][a].astype(jnp.float32)
        ).astype(jnp.float32).reshape(batch, seq, embed_dim)
        assert jnp.allclose(decoded[a].astype(jnp.float32), dec_ref,
                            atol=2e-2, rtol=2e-2), "decode mismatch"

    print("KERNEL_OK")
</pallas_src>

<mosaic_0001>
module attributes {stable_mosaic.version = 11 : i64} {
  func.func @_encode_kernel(%arg0: i32, %arg1: i32, %arg2: i32, %arg3: memref<1x16x128xbf16, #tpu.memory_space<vmem>>, %arg4: memref<1x128x128xbf16, #tpu.memory_space<vmem>>, %arg5: memref<1x128xf32, #tpu.memory_space<vmem>>, %arg6: memref<16x128xbf16, #tpu.memory_space<vmem>>, %arg7: memref<16x128xf32, #tpu.memory_space<vmem>>) attributes {dimension_semantics = [#tpu.dimension_semantics<parallel>, #tpu.dimension_semantics<parallel>, #tpu.dimension_semantics<arbitrary>], iteration_bounds = array<i64: 2, 2, 2>, scalar_prefetch = 0 : i64, scratch_operands = 1 : i64, tpu.core_type = #tpu.core_type<tc>, window_params = [{transform_indices = @transform_0, window_bounds = array<i64: 1, 16, 128>}, {transform_indices = @transform_1, window_bounds = array<i64: 1, 128, 128>}, {transform_indices = @transform_2, window_bounds = array<i64: 1, 128>}, {transform_indices = @transform_3, window_bounds = array<i64: 16, 128>}]} {
    %c0_i32 = arith.constant 0 : i32
    %0 = arith.cmpi eq, %arg2, %c0_i32 : i32
    %1 = arith.extui %0 : i1 to i32
    %c0_i32_0 = arith.constant 0 : i32
    %2 = arith.cmpi ne, %1, %c0_i32_0 : i32
    scf.if %2 {
      %cst_11 = arith.constant 0.000000e+00 : f32
      %14 = vector.broadcast %cst_11 : f32 to vector<16x128xf32>
      %c0_12 = arith.constant 0 : index
      %c0_13 = arith.constant 0 : index
      %15 = vector.load %arg7[%c0_12, %c0_13] : memref<16x128xf32, #tpu.memory_space<vmem>>, vector<16x128xf32>
      tpu.vector_store %arg7[%c0_12, %c0_13], %14 {strides = array<i32>} : memref<16x128xf32, #tpu.memory_space<vmem>>, vector<16x128xf32>,
    } else {
    }
    %c0 = arith.constant 0 : index
    %c0_1 = arith.constant 0 : index
    %3 = vector.load %arg7[%c0, %c0_1] : memref<16x128xf32, #tpu.memory_space<vmem>>, vector<16x128xf32>
    %c0_2 = arith.constant 0 : index
    %c0_3 = arith.constant 0 : index
    %c0_4 = arith.constant 0 : index
    %4 = vector.load %arg3[%c0_2, %c0_3, %c0_4] : memref<1x16x128xbf16, #tpu.memory_space<vmem>>, vector<1x16x128xbf16>
    %5 = vector.shape_cast %4 : vector<1x16x128xbf16> to vector<16x128xbf16>
    %c0_5 = arith.constant 0 : index
    %c0_6 = arith.constant 0 : index
    %c0_7 = arith.constant 0 : index
    %6 = vector.load %arg4[%c0_5, %c0_6, %c0_7] : memref<1x128x128xbf16, #tpu.memory_space<vmem>>, vector<1x128x128xbf16>
    %7 = vector.shape_cast %6 : vector<1x128x128xbf16> to vector<128x128xbf16>
    %cst = arith.constant dense<0.000000e+00> : vector<16x128xf32>
    %8 = tpu.matmul %5, %7, %cst {dimension_numbers = #tpu.dot_dimension_numbers<[1], [0], [0], [1], [0, 0, 1, 1], [], []>} : vector<16x128xbf16>, vector<128x128xbf16>, vector<16x128xf32> -> vector<16x128xf32>
    %9 = arith.addf %3, %8 : vector<16x128xf32>
    %c0_8 = arith.constant 0 : index
    %c0_9 = arith.constant 0 : index
    %10 = vector.load %arg7[%c0_8, %c0_9] : memref<16x128xf32, #tpu.memory_space<vmem>>, vector<16x128xf32>
    tpu.vector_store %arg7[%c0_8, %c0_9], %9 {strides = array<i32>} : memref<16x128xf32, #tpu.memory_space<vmem>>, vector<16x128xf32>,
    %c1_i32 = arith.constant 1 : i32
    %11 = arith.cmpi eq, %arg2, %c1_i32 : i32
    %12 = arith.extui %11 : i1 to i32
    %c0_i32_10 = arith.constant 0 : i32
    %13 = arith.cmpi ne, %12, %c0_i32_10 : i32
    scf.if %13 {
      %c0_11 = arith.constant 0 : index
      %c0_12 = arith.constant 0 : index
      %14 = vector.load %arg7[%c0_11, %c0_12] : memref<16x128xf32, #tpu.memory_space<vmem>>, vector<16x128xf32>
      %c0_13 = arith.constant 0 : index
      %c0_14 = arith.constant 0 : index
      %15 = vector.load %arg5[%c0_13, %c0_14] : memref<1x128xf32, #tpu.memory_space<vmem>>, vector<1x128xf32>
      %16 = vector.broadcast %15 : vector<1x128xf32> to vector<16x128xf32>
      %17 = arith.addf %14, %16 : vector<16x128xf32>
      %cst_15 = arith.constant 0.000000e+00 : f32
      %18 = vector.broadcast %cst_15 : f32 to vector<16x128xf32>
      %19 = arith.maximumf %17, %18 : vector<16x128xf32>
      %20 = arith.truncf %19 : vector<16x128xf32> to vector<16x128xbf16>
      %c0_16 = arith.constant 0 : index
      %c0_17 = arith.constant 0 : index
      %21 = vector.load %arg6[%c0_16, %c0_17] : memref<16x128xbf16, #tpu.memory_space<vmem>>, vector<16x128xbf16>
      tpu.vector_store %arg6[%c0_16, %c0_17], %20 {strides = array<i32>} : memref<16x128xbf16, #tpu.memory_space<vmem>>, vector<16x128xbf16>,
    } else {
    }
    return
  }
  func.func @transform_0(%arg0: i32, %arg1: i32, %arg2: i32) -> (i32, i32, i32) {
    %c0_i32 = arith.constant 0 : i32
    %c0_i32_0 = arith.constant 0 : i32
    return %arg2, %arg0, %c0_i32 : i32, i32, i32
  }
  func.func @transform_1(%arg0: i32, %arg1: i32, %arg2: i32) -> (i32, i32, i32) {
    %c0_i32 = arith.constant 0 : i32
    %c0_i32_0 = arith.constant 0 : i32
    return %arg2, %c0_i32, %arg1 : i32, i32, i32
  }
  func.func @transform_2(%arg0: i32, %arg1: i32, %arg2: i32) -> (i32, i32) {
    %c0_i32 = arith.constant 0 : i32
    %c0_i32_0 = arith.constant 0 : i32
    return %c0_i32, %arg1 : i32, i32
  }
  func.func @transform_3(%arg0: i32, %arg1: i32, %arg2: i32) -> (i32, i32) {
    %c0_i32 = arith.constant 0 : i32
    return %arg0, %arg1 : i32, i32
  }
}

</mosaic_0001>

<bundles_post_ra>
// kernel: tpu_custom_call.1
= control target key start
LH: loop header
LB: loop body
LE: loop exit
PB: predicated region body
PF: predicated region fallthrough
CT: control target
= control target key end

     0   :  { %s1513_s0 = inlined_call_operand.hbm [shape: bf16[2,32,128], index: 0, kind: input, shape index: {}]   ;;  %s1514_s1 = inlined_call_operand.hbm [shape: bf16[2,128,256], index: 1, kind: input, shape index: {}]   ;;  %s1515_s2 = inlined_call_operand.hbm [shape: f32[1,256], index: 2, kind: input, shape index: {}]   ;;  %s1516_s3 = inlined_call_operand.hbm [shape: bf16[32,256], index: 3, kind: output, shape index: {}]  }
   0x1   :  { %1537 = sst [smem:[#allocation31_spill]] %s1514_s1 }
   0x2   :  { %1538 = sst [smem:[#allocation32_spill]] %s1516_s3 }
   0x3   :  { %8 = vsyncpa [#allocation4], 0 }
   0x4   :  { %10 = vsyncpa [#allocation4 + $0x1], 0 }
   0x5   :  { %11 = vsyncpa [#allocation7], 0 }
   0x6   :  { %13 = vsyncpa [#allocation7 + $0x1], 0 }
   0x7   :  { %14 = vsyncpa [#allocation5], 0 }
   0x8   :  { %16 = vsyncpa [#allocation5 + $0x1], 0  ;;  %s1136_s12 = smov 0   ;;  %s1138_s13 = smov 0  }
   0x9   :  { %s1140_s14 = smov 0   ;;  %s1142_s15 = smov 0  }
   0xa   :  { %s1144_s16 = smov 0   ;;  %s1146_s17 = smov 0  }
   0xb   :  { %s1148_s18 = smov 0   ;;  %s1150_s19 = smov 0  }
   0xc   :  { %s1152_s20 = smov 0   ;;  %s1154_s21 = smov 0  }
   0xd   :  { %s1156_s22 = smov 0   ;;  %s1158_s23 = smov 0  }
   0xe   :  { %s1160_s24 = smov 0   ;;  %s1162_s25 = smov 0  }
   0xf   :  { %s1164_s26 = smov 0   ;;  %s1166_s27 = smov 0  }
  0x10   :  { %s1168_s28 = smov 0   ;;  %s1170_s29 = smov 0  }
  0x11   :  { %s1172_s30 = smov 0  }
  0x12 LB: > { %1539 = sst [smem:[#allocation14_spill]] %s1063_s19  ;;  %s1518_s4 = sadd.s32 1, %s1095_s27  ;;  %s1107_s30 = sphi %s1172_s30, %s22_s30   ;;  %s1103_s29 = sphi %s1170_s29, %s1604_s29   ;;  %s1099_s28 = sphi %s1168_s28, %s1603_s28   ;;  %s1095_s27 = sphi %s1166_s27, %s1592_s27   ;;  %s1091_s26 = sphi %s1164_s26, %s1591_s26   ;;  %s1087_s25 = sphi %s1162_s25, %s1602_s25   ;;  %s1083_s24 = sphi %s1160_s24, %s1590_s24   ;;  %s1079_s23 = sphi %s1158_s23, %s1589_s23   ;;  %s1075_s22 = sphi %s1156_s22, %s1588_s22   ;;  %s1071_s21 = sphi %s1154_s21, %s1587_s21   ;;  %s1067_s20 = sphi %s1152_s20, %s1586_s20   ;;  %s1063_s19 = sphi %s1150_s19, %s1585_s19   ;;  %s1059_s18 = sphi %s1148_s18, %s1584_s18   ;;  %s1055_s17 = sphi %s1146_s17, %s1601_s17   ;;  %s1051_s16 = sphi %s1144_s16, %s1600_s16   ;;  %s1047_s15 = sphi %s1142_s15, %s1598_s15   ;;  %s1043_s14 = sphi %s1140_s14, %s1597_s14   ;;  %s1039_s13 = sphi %s1138_s13, %s1595_s13   ;;  %s1035_s12 = sphi %s1136_s12, %s1593_s12  }
  0x13   : > { %1540 = sst [smem:[#allocation15_spill]] %s1067_s20  ;;  %p1235_p0 = scmp.ge.s32.totalorder %s1518_s4, 2 }
  0x14   : > { %1541 = sst [smem:[#allocation16_spill]] %s1075_s22  ;;  %p1532_p1 = scmp.eq.s32.totalorder %s1107_s30, 0 }
  0x15   : > { %1542 = sst [smem:[#allocation17_spill]] %s1079_s23  ;;  %p85_p2 = scmp.ne.s32.totalorder %s1067_s20, %s1063_s19 }
  0x16   : > { %1543 = sst [smem:[#allocation18_spill]] %s1083_s24  ;;  %p91_p3 = scmp.ne.s32.totalorder %s1063_s19, %s1059_s18 }
  0x17   : > { %1544 = sst [smem:[#allocation19_spill]] %s1087_s25  ;;  %p87_p4 = por %p85_p2, %p1532_p1 }
  0x18   : > { %1545 = sst [smem:[#allocation20_spill]] %s1091_s26  ;;  %p661_p5 = scmp.lt.s32.totalorder %s1107_s30, 8 }
  0x19   : > { %1546 = sst [smem:[#allocation21_spill]] %s1095_s27  ;;  %s193_s8 = sand.u32 1, %s1107_s30  }
  0x1a   : > { %1547 = sst [smem:[#allocation22_spill]] %s1103_s29  ;;  %s195_s9 = sand.u32 1, %s1067_s20  }
  0x1b   : > { %s573_s10 = sshll.u32 %s195_s9, 6  ;;  %s574_s11 = sshll.u32 %s1095_s27, 5 }
  0x1c   : > { %s201_s5 = sadd.s32 %s1099_s28, %s574_s11  ;;  %s197_s3 = scalar_lea.vmem [#allocation6], %s573_s10 }
  0x1d   : > { %s206_s4 = sshll.u32 %s197_s3, 4  ;;  %s575_s25 = sshll.u32 %s201_s5, 2  ;;  %s207_s4 = int_to_ptr.vmem [resolvable:$true] %s206_s4 }
  0x1e   : > { %s1549_s1 = sld [smem:[#allocation31_spill]]  ;;  %p651_p6 = pnand %p661_p5, %p87_p4 }
  0x1f   : > { %s1257_s3 = scalar_lea.sflag [#allocation7], %s193_s8  ;;  %s1109_s5 = smov 128  }
  0x20   : > { %s1519_s26 = smov 64   ;;  %s1520_s7 = smov 4  }
  0x21   : > { %p576_p7 = scmp.ge.s32.totalorder %s1107_s30, 1  ;;  %p231_p8 = scmp.lt.s32.totalorder %s1107_s30, 9 }
  0x22   : > { %s41_s10 = sadd.s32 1, %s1103_s29  ;;  %s1552_s11 = sadd.s32 1, %s1095_s27 }
  0x23   : > { %p1264_p9 = pnand %p576_p7, %p231_p8  ;;  %s1606_s11 = smov (%p1235_p0, %s1552_s11), 0 }
  0x24   : > { %s203_s24 = scalar_lea.hbm %s1549_s1, %s575_s25  ;;  %s1269_s25 = sadd.s32 4294967295, %s1107_s30  }
  0x25   : > { %s204_s9 = sshll.u32 %s203_s24, 4  ;;  %1553 = sst [smem:[#allocation24_spill]] %s1606_s11  ;;  %s205_s9 = int_to_ptr.hbm [resolvable:$true] %s204_s9 }
  0x26   : > { %653 = dma.hbm_to_vmem [thread:$0]  (!%p651_p6), %s205_s9, 1024, %s207_s4, %s1257_s3, %s1109_s5, %s1519_s26, %s1520_s7  }
  0x27   : > { %s1550_s24 = scalar_select %p1264_p9, 1, 0 }
  0x28   : > { %s1554_s4 = sadd.s32 1, %s1099_s28  ;;  %s45_s9 = ssub.s32 %s1095_s27, %s1606_s11 }
  0x29   : > { %1551 = sst [smem:[#allocation23_spill]] %s1550_s24  ;;  %s1608_s4 = smov (!%p1235_p0, %s1554_s4), %s1099_s28 }
  0x2a   : > { %s50_s5 = sadd.s32 1, %s1079_s23  ;;  %p39_p10 = scmp.ge.s32.totalorder %s1608_s4, 2 }
  0x2b   : > { %p57_p11 = scmp.ne.s32.totalorder %s1079_s23, %s1075_s22  ;;  %p63_p12 = scmp.ne.s32.totalorder %s1075_s22, %s1071_s21 }
  0x2c   : > { %p1530_p13 = scmp.eq.s32.totalorder %s1269_s25, 0  ;;  %s1610_s4 = smov (%p39_p10, %s1608_s4), 0 }
  0x2d   : > { %1555 = sst [smem:[#allocation25_spill]] %s1610_s4  ;;  %s1612_s10 = smov (!%p39_p10, %s41_s10), %s1103_s29 }
  0x2e   : > { %p1297_p2 = por %p1532_p1, %p57_p11  ;;  %p1303_p0 = por %p1530_p13, %p63_p12 }
  0x2f   : > { %p43_p4 = scmp.ge.s32.totalorder %s1612_s10, 2  ;;  %s1309_s21 = ssub.s32 %s1099_s28, %s1610_s4 }
  0x30   : > { %s1557_s26 = scalar_select %p1303_p0, 1, 0 }
  0x31   : > { %s75_s7 = sor.u32 %s1309_s21, %s45_s9  ;;  %p1317_p6 = por %p91_p3, %p1530_p13 }
  0x32   : > { %1558 = sst [smem:[#allocation26_spill]] %s1557_s26  ;;  %s1614_s10 = smov (%p43_p4, %s1612_s10), 0 }
  0x33   : > { %s1559_s8 = scalar_select %p1317_p6, 1, 0 }
  0x34   : > { %1561 = sst [smem:[#allocation28_spill]] %s1614_s10  ;;  %p76_p7 = scmp.eq.s32.totalorder %s75_s7, 0 }
  0x35   : > { %1560 = sst [smem:[#allocation27_spill]] %s1559_s8  ;;  %s132_s1 = sadd.s32 1, %s1043_s14 }
  0x36   : > { %s46_s4 = ssub.s32 %s1103_s29, %s1614_s10  ;;  %p142_p8 = scmp.ne.s32.totalorder %s1043_s14, %s1039_s13 }
  0x37   : > { %s47_s11 = sor.u32 %s46_s4, %s45_s9  ;;  %s129_s26 = sor.u32 %s1309_s21, %s46_s4 }
  0x38   : > { %p48_p10 = scmp.eq.s32.totalorder %s47_s11, 0  ;;  %p130_p11 = scmp.eq.s32.totalorder %s129_s26, 0 }
  0x39   : > { %s1562_s18 = sadd.s32 1, %s1067_s20  ;;  %p143_p3 = scmp.eq.s32.totalorder %s1269_s25, 7 }
  0x3a   : > { %s1332_s19 = scalar_select %p76_p7, %s1067_s20, %s1562_s18  }
  0x3b   : > { %s1335_s22 = scalar_select %p48_p10, %s1079_s23, %s50_s5  }
  0x3c   : > { %1563 = sst [smem:[#allocation29_spill]] %s1332_s19  ;;  %p148_p12 = scmp.ne.s32.totalorder %s1039_s13, %s1035_s12 }
  0x3d   : > { %1564 = sst [smem:[#allocation30_spill]] %s1335_s22  ;;  %s1565_s7 = sadd.s32 4294967294, %s1107_s30  }
  0x3e   : > { %s1338_s8 = scalar_select %p130_p11, %s1043_s14, %s132_s1  }
  0x3f   : > { %p149_p4 = scmp.eq.s32.totalorder %s1565_s7, 7  ;;  %s169_s10 = sand.u32 1, %s1079_s23  }
  0x40   : > { %p1346_p13 = por %p143_p3, %p142_p8  ;;  %s569_s11 = sshll.u32 %s169_s10, 3 }
  0x41   : > { %p1350_p1 = por %p149_p4, %p148_p12  ;;  %s570_s1 = sshll.u32 %s1103_s29, 1 }
  0x42   : > { %s571_s4 = sshll.u32 %s1095_s27, 2  ;;  %s173_s9 = scalar_lea.vmem [#allocation3], %s569_s11 }
  0x43   : > { %s183_s5 = sshll.u32 %s173_s9, 4  ;;  %s178_s18 = sadd.s32 %s571_s4, %s570_s1  ;;  %s184_s5 = int_to_ptr.vmem [resolvable:$true] %s183_s5 }
  0x44   : > { %s572_s7 = sshll.u32 %s178_s18, 2  ;;  %p648_p7 = pnand %p661_p5, %p1297_p2 }
  0x45   : > { %s180_s29 = scalar_lea.hbm %s1513_s0, %s572_s7  ;;  %s170_s27 = scalar_lea.sflag [#allocation4], %s169_s10 }
  0x46   : > { %s181_s19 = sshll.u32 %s180_s29, 4  ;;  %s1568_s20 = smov 4   ;;  %s182_s19 = int_to_ptr.hbm [resolvable:$true] %s181_s19 }
  0x47   : > { %s1569_s11 = smov 64   ;;  %p102_p8 = scmp.eq.s32.totalorder %s1309_s21, 0 }
  0x48   : > { %650 = dma.hbm_to_vmem [thread:$0]  (!%p648_p7), %s182_s19, 128, %s184_s5, %s170_s27, %s1569_s11, %s1569_s11, %s1568_s20  }
  0x49   : > { %s104_s1 = sadd.s32 1, %s1055_s17  ;;  %p111_p10 = scmp.ne.s32.totalorder %s1055_s17, %s1051_s16 }
  0x4a   : > { %p117_p11 = scmp.ne.s32.totalorder %s1051_s16, %s1047_s15  ;;  %p1570_p2 = scmp.eq.s32.totalorder %s1107_s30, 0 }
  0x4b   : > { %s1373_s6 = scalar_select %p102_p8, %s1055_s17, %s104_s1  }
  0x4c   : > { %p113_p3 = por %p111_p10, %p1570_p2  ;;  %p1571_p12 = scmp.eq.s32.totalorder %s1269_s25, 0 }
  0x4d   : > { %s218_s23 = sand.u32 1, %s1055_s17   ;;  %s222_s4 = scalar_lea.hbm %s1515_s2, %s1099_s28 }
  0x4e   : > { %p1379_p4 = por %p117_p11, %p1571_p12  ;;  %s224_s19 = sshll.u32 %s222_s4, 4  ;;  %s225_s19 = int_to_ptr.hbm [resolvable:$true] %s224_s19 }
  0x4f   : > { %s219_s20 = scalar_lea.vmem [#allocation8], %s218_s23  ;;  %p654_p7 = pnand %p661_p5, %p113_p3 }
  0x50   : > { %s226_s27 = sshll.u32 %s219_s20, 4  ;;  %235 = sbr.rel (%p1264_p9) target bundleno = 329 (0x149), region = 32  ;;  %s227_s27 = int_to_ptr.vmem [resolvable:$true] %s226_s27 }
  0x51   : > { %656 = dma.hbm_to_vmem [thread:$0]  (!%p654_p7), %s225_s19, 16, %s227_s27, %s1257_s3  }
  0x52   : > { %s1574_s21 = sld [smem:[#allocation16_spill]] (!%p1264_p9) }
  0x58   : > { %s237_s5 = sand.u32 1, %s1574_s21  }
  0x59   : > { %s1394_s18 = sshll.u32 %s237_s5, 3  ;;  %s238_s7 = scalar_lea.sflag [#allocation4], %s237_s5 }
  0x5a   : > { %s241_s11 = scalar_lea.vmem [#allocation3], %s1394_s18 }
  0x5b   : > { %1018 = dma.done.wait (%p1303_p0), %s238_s7, 128  }
  0x5c   : > { %1020 = vsyncadd (%p1303_p0), %s238_s7, 4294967168  ;;  %s1576_s1 = sld [smem:[#allocation14_spill]]  ;;  %s247_s3 = sand.u32 1, %s1269_s25  }
  0x5d   : > { %s248_s4 = scalar_lea.sflag [#allocation7], %s247_s3 }
  0x62   : > { %s249_s29 = sand.u32 1, %s1576_s1  }
  0x63   : > { %s578_s10 = sshll.u32 %s249_s29, 6 }
  0x64   : > { %s251_s19 = scalar_lea.vmem [#allocation6], %s578_s10 }
  0x65   : > { %1022 = dma.done.wait (%p1317_p6), %s248_s4, 1024  }
  0x66   : > { %1024 = vsyncadd (%p1317_p6), %s248_s4, 4294966272  ;;  %s259_s20 = sand.u32 1, %s1051_s16  }
  0x67   : > { %s1408_s27 = scalar_lea.vmem [#allocation8], %s259_s20 }
  0x68   : > { %1026 = dma.done.wait (%p1379_p4), %s248_s4, 16  }
  0x69   : > { %1028 = vsyncadd (%p1379_p4), %s248_s4, 4294967280  ;;  %s290_s25 = sand.u32 1, %s1039_s13   ;;  %s1578_s9 = sld [smem:[#allocation18_spill]] }
  0x6a   : > { %s1417_s15 = sshll.u32 %s290_s25, 3 }
  0x6b   : > { %s292_s21 = scalar_lea.vmem [#allocation9], %s1417_s15 }
  0x6f   : > { %p580_p5 = scmp.ne.s32.totalorder %s1578_s9, 0 }
  0x71   : > { %298 = sbr.rel (%p580_p5) target bundleno = 121 (0x79), region = 48 }
  0x76   : > { %v1112_v0 = vmov 0.0  }
  0x77   : > { %299 = vst [vmem:[#allocation2] sm:$0xff] %v1112_v0 }
  0x78   : > { %300 = vst [vmem:[#allocation2 + $0x8] sm:$0xff] %v1112_v0 }
  0x79 PF: > { %v632_v1 = vld [vmem:[%s251_s19 + $0x38] sm:$0xff]  ;;  %v631_v2 = vld [vmem:[%s251_s19 + $0x30] sm:$0xff]  ;;  %v630_v3 = vld [vmem:[%s251_s19 + $0x28] sm:$0xff]  ;;  %s1579_s22 = sld [smem:[#allocation18_spill]] }
  0x7a   : > { %375 = vmatpush.bf16.msra.mxu0 %v632_v1  ;;  %v629_v4 = vld [vmem:[%s251_s19 + $0x20] sm:$0xff]  ;;  %v628_v5 = vld [vmem:[%s251_s19 + $0x18] sm:$0xff]  ;;  %v627_v6 = vld [vmem:[%s251_s19 + $0x10] sm:$0xff] }
  0x7b   : > { %v626_v7 = vld [vmem:[%s251_s19 + $0x8] sm:$0xff]  ;;  %v625_v8 = vld [vmem:[%s251_s19] sm:$0xff]  ;;  %v624_v9 = vld [vmem:[%s241_s11] sm:$0xff] }
  0x7e   : > { %376 = vmatpush.bf16.msra.mxu0 %v631_v2  ;;  %v301_v10 = vld [vmem:[#allocation2] sm:$0xff] }
  0x7f   : > { %v302_v13 = vld [vmem:[#allocation2 + $0x8] sm:$0xff]  ;;  %p617_p9 = scmp.ne.s32.totalorder %s1579_s22, 1 }
  0x82   : > { %377 = vmatpush.bf16.msra.mxu0 %v630_v3 }
  0x86   : > { %378 = vmatpush.bf16.msra.mxu0 %v629_v4 }
  0x8a   : > { %379 = vmatpush.bf16.msra.mxu0 %v628_v5 }
  0x8e   : > { %380 = vmatpush.bf16.msra.mxu0 %v627_v6 }
  0x92   : > { %381 = vmatpush.bf16.msra.mxu0 %v626_v7 }
  0x96   : > { %382 = vmatpush.bf16.msra.mxu0 %v625_v8 }
  0x99   : > { %383 = vmatmul.bf16.vlgmr.msra.gmra.mxu0 %v624_v9 }
 0x116   : > { %v384_v11 = vpop.f32.mrf.mxu0 }
 0x117   : > { %v389_v12 = vadd.f32 %v384_v11, %v301_v10 }
 0x119   : > { %391 = vst [vmem:[#allocation2] sm:$0xff] %v389_v12 }
 0x11d   : > { %396 = sbr.rel (%p617_p9) target bundleno = 304 (0x130), region = 52 }
 0x11e   : > { %v386_v14 = vpop.f32.mrf.mxu0 }
 0x11f   : > { %v390_v15 = vadd.f32 %v386_v14, %v302_v13 }
 0x121   : > { %392 = vst [vmem:[#allocation2 + $0x8] sm:$0xff] %v390_v15 }
 0x122   : > { %v397_v16 = vld [vmem:[#allocation2] sm:$0xff] }
 0x123   : > { %v822_v18 = vld [vmem:[%s1408_s27] ss:$0 sm:$0xff] }
 0x124   : > { %v403_v19 = vadd.f32 %v822_v18, %v397_v16 }
 0x126   : > { %v405_v21 = vmax.f32 %v403_v19, 0.0 }
 0x128   : > { %v398_v17 = vld [vmem:[#allocation2 + $0x8] sm:$0xff] }
 0x129   : > { %v404_v20 = vadd.f32 %v822_v18, %v398_v17 }
 0x12b   : > { %v406_v22 = vmax.f32 %v404_v20, 0.0 }
 0x12d   : > { %v637_v23 = vpack.c.bf16 %v406_v22, %v405_v21 }
 0x12f   : > { %638 = vst [vmem:[%s292_s21] sm:$0xff] %v637_v23  }
 0x130 PF: > { %s1580_s5 = sld [smem:[#allocation20_spill]]  ;;  %s426_s1 = sshll.u32 %s292_s21, 4  ;;  %s427_s1 = int_to_ptr.vmem [resolvable:$true] %s426_s1 }
 0x131   : > { %s1581_s18 = sld [smem:[#allocation19_spill]]  ;;  %s412_s20 = scalar_lea.sflag [#allocation5], %s290_s25 }
 0x132   : > { %s1582_s10 = sld [smem:[#allocation32_spill]] }
 0x136   : > { %s633_s7 = sshll.u32 %s1580_s5, 2 }
 0x137   : > { %s423_s11 = sadd.s32 %s1581_s18, %s633_s7 }
 0x138   : > { %s621_s23 = sshll.u32 %s423_s11, 2  ;;  %s933_s21 = scalar_lea.hbm %s1582_s10, 32 }
 0x139   : > { %s425_s4 = scalar_lea.hbm %s1582_s10, %s621_s23 }
 0x13a   : > { %s428_s19 = sshll.u32 %s425_s4, 4  ;;  %s429_s19 = int_to_ptr.hbm [resolvable:$true] %s428_s19 }
 0x13b   : > { %s927_s27 = sshra.s32 %s429_s19, 4  ;;  %s928_s27 = int_to_ptr.hbm [resolvable:$true] %s927_s27 }
 0x13c   : > { %s929_s9 = scalar_lea.hbm %s928_s27, 8  ;;  %p934_p10 = scmp.lt.s32.totalorder %s928_s27, %s1582_s10 }
 0x13d   : > { %p930_p0 = scmp.ne.s32.totalorder %s928_s27, %s929_s9  ;;  %p935_p11 = scmp.lt.s32.totalorder %s933_s21, %s929_s9 }
 0x13f   : > { %p931_p6 = pnand %p930_p0, %p1346_p13  ;;  %p936_p2 = por %p935_p11, %p934_p10 }
 0x141   : > { %p932_p8 = pneg %p931_p6 }
 0x143   : > { %p937_p3 = pnand %p936_p2, %p932_p8 }
 0x145   : > { %940 = shalt.err (!%p937_p3)
}
 0x146   : > { %s1113_s25 = smov 64   ;;  %s1114_s7 = smov 128  }
 0x147   : > { %s1115_s11 = smov 4  }
 0x148   : > { %645 = dma.vmem_to_hbm [thread:$0]  (%p1346_p13), %s427_s1, 128, %s429_s19, %s412_s20, %s1113_s25, %s1114_s7, %s1115_s11  }
 0x149 PF: > { %p662_p12 = scmp.ge.s32.totalorder %s1107_s30, 2  ;;  %s443_s23 = sand.u32 1, %s1035_s12  }
 0x14a   : > { %s444_s3 = scalar_lea.sflag [#allocation5], %s443_s23 }
 0x14b   : > { %p658_p4 = pnand %p662_p12, %p1350_p1 }
 0x14d   : > { %p659_p7 = pneg %p658_p4 }
 0x14f   : > { %1030 = dma.done.wait (%p659_p7), %s444_s3, 128  }
 0x150   : > { %1032 = vsyncadd (%p659_p7), %s444_s3, 4294967168  ;;  %s22_s30 = sadd.s32 1, %s1107_s30   ;;  %s1584_s18 = sld [smem:[#allocation14_spill]] }
 0x151   : > { %p1451_p5 = scmp.ge.s32.totalorder %s22_s30, 10   ;;  %s1585_s19 = sld [smem:[#allocation15_spill]] }
 0x152   : > { %s1586_s20 = sld [smem:[#allocation29_spill]]  ;;  %s1593_s12 = smov %s1039_s13 }
 0x153   : > { %s1587_s21 = sld [smem:[#allocation16_spill]]  ;;  %s1595_s13 = smov %s1043_s14 }
 0x154   : > { %s1588_s22 = sld [smem:[#allocation17_spill]]  ;;  %s1597_s14 = smov %s1338_s8 }
 0x155   : > { %s1589_s23 = sld [smem:[#allocation30_spill]]  ;;  %s1598_s15 = smov %s1051_s16 }
 0x156   : > { %s1590_s24 = sld [smem:[#allocation21_spill]]  ;;  %s1600_s16 = smov %s1055_s17 }
 0x157   : > { %s1591_s26 = sld [smem:[#allocation22_spill]]  ;;  %s1601_s17 = smov %s1373_s6 }
 0x158   : > { %s1592_s27 = sld [smem:[#allocation24_spill]]  ;;  %s1602_s25 = smov %s1099_s28 }
 0x159   : > { %s1594_s1 = sld [smem:[#allocation25_spill]] }
 0x15a   : > { %s1596_s4 = sld [smem:[#allocation28_spill]] }
 0x15c   :  { %21 = sbr.rel (!%p1451_p5) target bundleno = 18 (0x12), region = 109 }
 0x15f   : > { %s1603_s28 = smov %s1594_s1 }
 0x160   : > { %s1604_s29 = smov %s1596_s4 }
 0x161   :  { %450 = vsyncpa [#allocation4], 1 }
 0x162   :  { %452 = vsyncpa [#allocation4 + $0x1], 1 }
 0x163   :  { %453 = vsyncpa [#allocation7], 1 }
 0x164   :  { %455 = vsyncpa [#allocation7 + $0x1], 1 }
 0x165   :  { %456 = vsyncpa [#allocation5], 1 }
 0x166   :  { %458 = vsyncpa [#allocation5 + $0x1], 1 }

</bundles_post_ra>
